<compile_context>
chip_gen: v7x
topology: tpu7x:2x2x1
jax: 0.10.0
libtpu: 0.0.40
codegen_flags: <defaults>
</compile_context>

<pallas_src>
import functools

import jax
import jax.numpy as jnp
from jax import lax
from jax.experimental import pallas as pl
from jax.experimental.pallas import tpu as pltpu


def _round_up(x, m):
    return (x + m - 1) // m * m


# -----------------------------------------------------------------------------
# Fused kernel: stage-1 matmul -> bf16 VMEM activation -> 9 stage-2 tap matmuls.
# One batch element per grid step.
# -----------------------------------------------------------------------------
def _patch_embed_kernel(lhs1_ref, w1_ref, s1_ref, w2_ref, s2_ref, o_ref, y1_ref,
                        *, chunk, n_chunks, tap_offsets, m2_rows):
    # lhs1_ref : (R1p, K1p) bf16  phase-ordered stage-1 im2col (+ halo-kill lane)
    # w1_ref   : (K1p, N1p) bf16  BN-folded stage-1 weights
    # s1_ref   : (1, N1p)   f32   folded stage-1 shift
    # w2_ref   : (9, N1p, N2p) bf16 BN-folded stage-2 per-tap weights
    # s2_ref   : (1, N2p)   f32   folded stage-2 shift
    # o_ref    : (M2p, N2p) f32   stage-2 output rows (junk col / pad rows included)
    # y1_ref   : (R1p, N1p) bf16  VMEM scratch holding the stage-1 activation

    # ---- stage 1: one lane-dense K=128 matmul, chunked over rows ----
    for c in range(n_chunks):
        rows = pl.ds(c * chunk, chunk)
        acc1 = jnp.dot(lhs1_ref[rows, :], w1_ref[...],
                       preferred_element_type=jnp.float32)
        y1_ref[rows, :] = jnp.maximum(acc1 + s1_ref[...], 0.0).astype(y1_ref.dtype)

    # ---- stage 2: 9 tap matmuls; each LHS is a static contiguous row slice ----
    o_ref[...] = jnp.zeros_like(o_ref)
    for t, off in enumerate(tap_offsets):
        o_ref[...] += jnp.dot(y1_ref[pl.ds(off, m2_rows), :], w2_ref[t],
                              preferred_element_type=jnp.float32)
    o_ref[...] = jnp.maximum(o_ref[...] + s2_ref[...], 0.0)


# -----------------------------------------------------------------------------
# Forward: NCHW in -> (B, dim, H/4, W/4) out.
# -----------------------------------------------------------------------------
@jax.jit
def patch_embed_forward(x_nchw, params):
    eps = 1e-4
    w1, b1 = params["w1"], params["b1"]
    g1, be1, rm1, rv1 = params["g1"], params["be1"], params["rm1"], params["rv1"]
    w2, b2 = params["w2"], params["b2"]
    g2, be2, rm2, rv2 = params["g2"], params["be2"], params["rm2"], params["rv2"]

    B, C, H, W = x_nchw.shape
    N1, N2 = w1.shape[0], w2.shape[0]
    H1, W1 = (H + 1) // 2, (W + 1) // 2          # stage-1 output spatial
    H2, W2 = (H1 + 1) // 2, (W1 + 1) // 2        # stage-2 output spatial

    K1 = 9 * C
    K1p = _round_up(K1 + 1, 128)                 # +1 halo-kill lane, lane dense
    N1p = _round_up(N1, 128)
    N2p = _round_up(N2, 128)

    Bph = W2 + 1                                 # phase width (1 junk column)
    P = (H2 + 1) * Bph                           # rows per parity phase
    M2r = H2 * Bph                               # real stage-2 output rows (junk col incl.)
    M2p = _round_up(M2r, 8)
    R1_min = max(4 * P, 3 * P + M2p)
    if R1_min <= 512:
        R1p = _round_up(R1_min, 8)
        chunk = R1p
    else:
        chunk = 512
        R1p = _round_up(R1_min, chunk)
    n_chunks = R1p // chunk

    # ---- fold eval-mode BatchNorm into weights + per-channel shift ----
    scale1 = g1 * lax.rsqrt(rv1 + eps)
    shift1 = (b1 - rm1) * scale1 + be1
    w1f = jnp.transpose(w1, (2, 3, 1, 0)).reshape(K1, N1) * scale1[None, :]
    w1p = jnp.zeros((K1p, N1p), jnp.float32)
    w1p = w1p.at[:K1, :N1].set(w1f)
    w1p = w1p.at[K1, :].set(-1e9)                # halo-kill row -> ReLU clamps pads to 0
    w1p = w1p.astype(jnp.bfloat16)
    s1p = jnp.zeros((1, N1p), jnp.float32).at[0, :N1].set(shift1)

    scale2 = g2 * lax.rsqrt(rv2 + eps)
    shift2 = (b2 - rm2) * scale2 + be2
    w2f = (jnp.transpose(w2, (2, 3, 1, 0)) * scale2).reshape(9, N1, N2)
    w2p = jnp.zeros((9, N1p, N2p), jnp.float32).at[:, :N1, :N2].set(w2f)
    w2p = w2p.astype(jnp.bfloat16)
    s2p = jnp.zeros((1, N2p), jnp.float32).at[0, :N2].set(shift2)

    # ---- stage-1 im2col (tap-major channels), phase-ordered with halo indicator ----
    x = jnp.transpose(x_nchw, (0, 2, 3, 1)).astype(jnp.float32)          # NHWC
    xp = jnp.pad(x, ((0, 0), (1, 2 * H1 - H), (1, 2 * W1 - W), (0, 0)))
    patches = jnp.concatenate(
        [xp[:, dh::2, dw::2, :][:, :H1, :W1, :]
         for dh in range(3) for dw in range(3)], axis=-1)                # (B,H1,W1,9C)

    padh = (1, 2 * H2 + 1 - H1)                  # pad stage-1 grid to ip in [0, 2*H2+1]
    padw = (1, 2 * W2 + 1 - W1)
    pat_p = jnp.pad(patches, ((0, 0), padh, padw, (0, 0)))
    ind = jnp.pad(jnp.zeros((B, H1, W1, 1), jnp.float32),
                  ((0, 0), padh, padw, (0, 0)), constant_values=1.0)     # halo indicator
    fill = jnp.zeros((B, pat_p.shape[1], pat_p.shape[2], K1p - K1 - 1), jnp.float32)
    big = jnp.concatenate([pat_p, ind, fill], axis=-1)                   # (B,2H2+2,2W2+2,K1p)

    phases = [big[:, r::2, s::2, :][:, :H2 + 1, :W2 + 1, :].reshape(B, P, K1p)
              for r in (0, 1) for s in (0, 1)]
    halo_row = jnp.zeros((K1p,), jnp.float32).at[K1].set(1.0)
    tail = jnp.broadcast_to(halo_row, (B, R1p - 4 * P, K1p))
    lhs1 = jnp.concatenate(phases + [tail], axis=1).astype(jnp.bfloat16)  # (B,R1p,K1p)

    # stage-2 tap (dh,dw) -> static row offset into the phase-ordered activation
    tap_offsets = tuple(
        (2 * (dh % 2) + (dw % 2)) * P + (dh // 2) * Bph + (dw // 2)
        for dh in range(3) for dw in range(3))

    kernel = functools.partial(_patch_embed_kernel, chunk=chunk, n_chunks=n_chunks,
                               tap_offsets=tap_offsets, m2_rows=M2p)

    flops = 2 * B * (R1p * K1p * N1p + 9 * M2p * N1p * N2p)
    bytes_accessed = (B * R1p * K1p * 2 + K1p * N1p * 2 + 9 * N1p * N2p * 2
                      + B * M2p * N2p * 4 + (N1p + N2p) * 4)
    vmem_need = (2 * R1p * K1p * 2          # lhs1 (bf16, double buffered)
                 + R1p * N1p * 2            # y1 scratch (bf16)
                 + 2 * M2p * N2p * 4        # output block (f32, double buffered)
                 + 2 * (K1p * N1p + 9 * N1p * N2p) * 2
                 + chunk * N1p * 4 + 4 * (N1p + N2p))
    vmem_limit = int(min(64 * 1024 * 1024, max(16 * 1024 * 1024, 2 * vmem_need)))

    out = pl.pallas_call(
        kernel,
        out_shape=jax.ShapeDtypeStruct((B, M2p, N2p), jnp.float32),
        grid_spec=pltpu.PrefetchScalarGridSpec(
            num_scalar_prefetch=0,
            grid=(B,),
            in_specs=[
                pl.BlockSpec((None, R1p, K1p), lambda b: (b, 0, 0)),
                pl.BlockSpec((K1p, N1p), lambda b: (0, 0)),
                pl.BlockSpec((1, N1p), lambda b: (0, 0)),
                pl.BlockSpec((9, N1p, N2p), lambda b: (0, 0, 0)),
                pl.BlockSpec((1, N2p), lambda b: (0, 0)),
            ],
            out_specs=pl.BlockSpec((None, M2p, N2p), lambda b: (b, 0, 0)),
            scratch_shapes=[pltpu.VMEM((R1p, N1p), jnp.bfloat16)],
        ),
        compiler_params=pltpu.CompilerParams(
            dimension_semantics=("parallel",),
            vmem_limit_bytes=vmem_limit,
        ),
        cost_estimate=pl.CostEstimate(flops=flops, transcendentals=0,
                                      bytes_accessed=bytes_accessed),
    )(lhs1, w1p, s1p, w2p, s2p)

    # drop junk column / padded rows / padded channels, go back to NCHW
    out = out[:, :M2r, :N2].reshape(B, H2, Bph, N2)[:, :, :W2, :]
    return jnp.transpose(out, (0, 3, 1, 2))


# -----------------------------------------------------------------------------
# lax.conv reference with the SAME arithmetic as the kernel (BN folded, bf16
# matmul operands, f32 accumulation, bf16 stage-1 activation).
# -----------------------------------------------------------------------------
def _ref_stage(x_nhwc, w_oihw, bias, gamma, beta, rmean, rvar, eps=1e-4):
    scale = gamma * lax.rsqrt(rvar + eps)
    shift = (bias - rmean) * scale + beta
    w_hwio = (jnp.transpose(w_oihw, (2, 3, 1, 0)) * scale).astype(jnp.bfloat16)
    y = lax.conv_general_dilated(
        x_nhwc.astype(jnp.bfloat16), w_hwio, window_strides=(2, 2),
        padding=((1, 1), (1, 1)), dimension_numbers=("NHWC", "HWIO", "NHWC"),
        preferred_element_type=jnp.float32)
    return jnp.maximum(y + shift, 0.0)


def _reference(x_nchw, params):
    x = jnp.transpose(x_nchw, (0, 2, 3, 1)).astype(jnp.float32)
    y1 = _ref_stage(x, params["w1"], params["b1"], params["g1"],
                    params["be1"], params["rm1"], params["rv1"])
    y1 = y1.astype(jnp.bfloat16).astype(jnp.float32)   # kernel stores y1 as bf16
    y2 = _ref_stage(y1, params["w2"], params["b2"], params["g2"],
                    params["be2"], params["rm2"], params["rv2"])
    return jnp.transpose(y2, (0, 3, 1, 2))


# -----------------------------------------------------------------------------
# Main
# -----------------------------------------------------------------------------
if __name__ == "__main__":
    # PatchEmbed defaults: in_channels=3, in_dim=64, dim=96; small spatial size.
    B, Cin, H, W = 2, 3, 16, 16
    in_dim, dim = 64, 96

    key = jax.random.PRNGKey(0)
    ks = jax.random.split(key, 13)

    params = {
        "w1": 0.1 * jax.random.normal(ks[0], (in_dim, Cin, 3, 3), jnp.float32),
        "b1": 0.05 * jax.random.normal(ks[1], (in_dim,), jnp.float32),
        "g1": 1.0 + 0.1 * jax.random.normal(ks[2], (in_dim,), jnp.float32),
        "be1": 0.1 * jax.random.normal(ks[3], (in_dim,), jnp.float32),
        "rm1": 0.05 * jax.random.normal(ks[4], (in_dim,), jnp.float32),
        "rv1": 1.0 + 0.1 * jax.nn.softplus(jax.random.normal(ks[5], (in_dim,), jnp.float32)),
        "w2": 0.1 * jax.random.normal(ks[6], (dim, in_dim, 3, 3), jnp.float32),
        "b2": 0.05 * jax.random.normal(ks[7], (dim,), jnp.float32),
        "g2": 1.0 + 0.1 * jax.random.normal(ks[8], (dim,), jnp.float32),
        "be2": 0.1 * jax.random.normal(ks[9], (dim,), jnp.float32),
        "rm2": 0.05 * jax.random.normal(ks[10], (dim,), jnp.float32),
        "rv2": 1.0 + 0.1 * jax.nn.softplus(jax.random.normal(ks[11], (dim,), jnp.float32)),
    }

    x = jax.random.normal(ks[12], (B, Cin, H, W), jnp.float32)   # NCHW input

    out = jax.block_until_ready(patch_embed_forward(x, params))
    assert out.shape == (B, dim, H // 4, W // 4), out.shape

    ref = jax.block_until_ready(_reference(x, params))
    max_err = float(jnp.max(jnp.abs(out - ref)))
    assert jnp.allclose(out, ref, atol=2e-2, rtol=2e-2), max_err

    print("KERNEL_OK")
</pallas_src>

<mosaic_0001>
module attributes {stable_mosaic.version = 11 : i64} {
  func.func @_patch_embed_kernel(%arg0: i32, %arg1: memref<1x104x128xbf16, #tpu.memory_space<vmem>>, %arg2: memref<128x128xbf16, #tpu.memory_space<vmem>>, %arg3: memref<1x128xf32, #tpu.memory_space<vmem>>, %arg4: memref<9x128x128xbf16, #tpu.memory_space<vmem>>, %arg5: memref<1x128xf32, #tpu.memory_space<vmem>>, %arg6: memref<1x24x128xf32, #tpu.memory_space<vmem>>, %arg7: memref<104x128xbf16, #tpu.memory_space<vmem>>) attributes {dimension_semantics = [#tpu.dimension_semantics<parallel>], iteration_bounds = array<i64: 2>, scalar_prefetch = 0 : i64, scratch_operands = 1 : i64, tpu.core_type = #tpu.core_type<tc>, window_params = [{transform_indices = @transform_0, window_bounds = array<i64: 1, 104, 128>}, {pipeline_mode = #tpu.pipeline_mode<synchronous>, transform_indices = @transform_1, window_bounds = array<i64: 128, 128>}, {pipeline_mode = #tpu.pipeline_mode<synchronous>, transform_indices = @transform_2, window_bounds = array<i64: 1, 128>}, {pipeline_mode = #tpu.pipeline_mode<synchronous>, transform_indices = @transform_3, window_bounds = array<i64: 9, 128, 128>}, {pipeline_mode = #tpu.pipeline_mode<synchronous>, transform_indices = @transform_4, window_bounds = array<i64: 1, 128>}, {transform_indices = @transform_5, window_bounds = array<i64: 1, 24, 128>}]} {
    %c0 = arith.constant 0 : index
    %c0_0 = arith.constant 0 : index
    %c0_1 = arith.constant 0 : index
    %0 = vector.load %arg1[%c0, %c0_0, %c0_1] : memref<1x104x128xbf16, #tpu.memory_space<vmem>>, vector<1x104x128xbf16>
    %1 = vector.shape_cast %0 : vector<1x104x128xbf16> to vector<104x128xbf16>
    %c0_2 = arith.constant 0 : index
    %c0_3 = arith.constant 0 : index
    %2 = vector.load %arg2[%c0_2, %c0_3] : memref<128x128xbf16, #tpu.memory_space<vmem>>, vector<128x128xbf16>
    %cst = arith.constant dense<0.000000e+00> : vector<104x128xf32>
    %3 = tpu.matmul %1, %2, %cst {dimension_numbers = #tpu.dot_dimension_numbers<[1], [0], [0], [1], [0, 0, 1, 1], [], []>} : vector<104x128xbf16>, vector<128x128xbf16>, vector<104x128xf32> -> vector<104x128xf32>
    %c0_4 = arith.constant 0 : index
    %c0_5 = arith.constant 0 : index
    %4 = vector.load %arg3[%c0_4, %c0_5] : memref<1x128xf32, #tpu.memory_space<vmem>>, vector<1x128xf32>
    %5 = vector.broadcast %4 : vector<1x128xf32> to vector<104x128xf32>
    %6 = arith.addf %3, %5 : vector<104x128xf32>
    %cst_6 = arith.constant 0.000000e+00 : f32
    %7 = vector.broadcast %cst_6 : f32 to vector<104x128xf32>
    %8 = arith.maximumf %6, %7 : vector<104x128xf32>
    %9 = arith.truncf %8 : vector<104x128xf32> to vector<104x128xbf16>
    %c0_7 = arith.constant 0 : index
    %c0_8 = arith.constant 0 : index
    %10 = vector.load %arg7[%c0_7, %c0_8] : memref<104x128xbf16, #tpu.memory_space<vmem>>, vector<104x128xbf16>
    tpu.vector_store %arg7[%c0_7, %c0_8], %9 {strides = array<i32>} : memref<104x128xbf16, #tpu.memory_space<vmem>>, vector<104x128xbf16>,
    %cst_9 = arith.constant 0.000000e+00 : f32
    %11 = vector.broadcast %cst_9 : f32 to vector<24x128xf32>
    %c0_10 = arith.constant 0 : index
    %c0_11 = arith.constant 0 : index
    %c0_12 = arith.constant 0 : index
    %12 = vector.load %arg6[%c0_10, %c0_11, %c0_12] : memref<1x24x128xf32, #tpu.memory_space<vmem>>, vector<1x24x128xf32>
    %13 = vector.shape_cast %12 : vector<1x24x128xf32> to vector<24x128xf32>
    %14 = vector.shape_cast %11 : vector<24x128xf32> to vector<1x24x128xf32>
    tpu.vector_store %arg6[%c0_10, %c0_11, %c0_12], %14 {strides = array<i32>} : memref<1x24x128xf32, #tpu.memory_space<vmem>>, vector<1x24x128xf32>,
    %c0_13 = arith.constant 0 : index
    %c0_14 = arith.constant 0 : index
    %c0_15 = arith.constant 0 : index
    %15 = vector.load %arg6[%c0_13, %c0_14, %c0_15] : memref<1x24x128xf32, #tpu.memory_space<vmem>>, vector<1x24x128xf32>
    %16 = vector.shape_cast %15 : vector<1x24x128xf32> to vector<24x128xf32>
    %c0_16 = arith.constant 0 : index
    %c0_17 = arith.constant 0 : index
    %17 = vector.load %arg7[%c0_16, %c0_17] : memref<104x128xbf16, #tpu.memory_space<vmem>>, vector<24x128xbf16>
    %c0_18 = arith.constant 0 : index
    %c0_19 = arith.constant 0 : index
    %c0_20 = arith.constant 0 : index
    %18 = vector.load %arg4[%c0_18, %c0_19, %c0_20] : memref<9x128x128xbf16, #tpu.memory_space<vmem>>, vector<1x128x128xbf16>
    %19 = vector.shape_cast %18 : vector<1x128x128xbf16> to vector<128x128xbf16>
    %cst_21 = arith.constant dense<0.000000e+00> : vector<24x128xf32>
    %20 = tpu.matmul %17, %19, %cst_21 {dimension_numbers = #tpu.dot_dimension_numbers<[1], [0], [0], [1], [0, 0, 1, 1], [], []>} : vector<24x128xbf16>, vector<128x128xbf16>, vector<24x128xf32> -> vector<24x128xf32>
    %21 = arith.addf %16, %20 : vector<24x128xf32>
    %c0_22 = arith.constant 0 : index
    %c0_23 = arith.constant 0 : index
    %c0_24 = arith.constant 0 : index
    %22 = vector.load %arg6[%c0_22, %c0_23, %c0_24] : memref<1x24x128xf32, #tpu.memory_space<vmem>>, vector<1x24x128xf32>
    %23 = vector.shape_cast %22 : vector<1x24x128xf32> to vector<24x128xf32>
    %24 = vector.shape_cast %21 : vector<24x128xf32> to vector<1x24x128xf32>
    tpu.vector_store %arg6[%c0_22, %c0_23, %c0_24], %24 {strides = array<i32>} : memref<1x24x128xf32, #tpu.memory_space<vmem>>, vector<1x24x128xf32>,
    %c0_25 = arith.constant 0 : index
    %c0_26 = arith.constant 0 : index
    %c0_27 = arith.constant 0 : index
    %25 = vector.load %arg6[%c0_25, %c0_26, %c0_27] : memref<1x24x128xf32, #tpu.memory_space<vmem>>, vector<1x24x128xf32>
    %26 = vector.shape_cast %25 : vector<1x24x128xf32> to vector<24x128xf32>
    %c25 = arith.constant 25 : index
    %c0_28 = arith.constant 0 : index
    %27 = vector.load %arg7[%c25, %c0_28] : memref<104x128xbf16, #tpu.memory_space<vmem>>, vector<24x128xbf16>
    %c1 = arith.constant 1 : index
    %c0_29 = arith.constant 0 : index
    %c0_30 = arith.constant 0 : index
    %28 = vector.load %arg4[%c1, %c0_29, %c0_30] : memref<9x128x128xbf16, #tpu.memory_space<vmem>>, vector<1x128x128xbf16>
    %29 = vector.shape_cast %28 : vector<1x128x128xbf16> to vector<128x128xbf16>
    %cst_31 = arith.constant dense<0.000000e+00> : vector<24x128xf32>
    %30 = tpu.matmul %27, %29, %cst_31 {dimension_numbers = #tpu.dot_dimension_numbers<[1], [0], [0], [1], [0, 0, 1, 1], [], []>} : vector<24x128xbf16>, vector<128x128xbf16>, vector<24x128xf32> -> vector<24x128xf32>
    %31 = arith.addf %26, %30 : vector<24x128xf32>
    %c0_32 = arith.constant 0 : index
    %c0_33 = arith.constant 0 : index
    %c0_34 = arith.constant 0 : index
    %32 = vector.load %arg6[%c0_32, %c0_33, %c0_34] : memref<1x24x128xf32, #tpu.memory_space<vmem>>, vector<1x24x128xf32>
    %33 = vector.shape_cast %32 : vector<1x24x128xf32> to vector<24x128xf32>
    %34 = vector.shape_cast %31 : vector<24x128xf32> to vector<1x24x128xf32>
    tpu.vector_store %arg6[%c0_32, %c0_33, %c0_34], %34 {strides = array<i32>} : memref<1x24x128xf32, #tpu.memory_space<vmem>>, vector<1x24x128xf32>,
    %c0_35 = arith.constant 0 : index
    %c0_36 = arith.constant 0 : index
    %c0_37 = arith.constant 0 : index
    %35 = vector.load %arg6[%c0_35, %c0_36, %c0_37] : memref<1x24x128xf32, #tpu.memory_space<vmem>>, vector<1x24x128xf32>
    %36 = vector.shape_cast %35 : vector<1x24x128xf32> to vector<24x128xf32>
    %c1_38 = arith.constant 1 : index
    %c0_39 = arith.constant 0 : index
    %37 = vector.load %arg7[%c1_38, %c0_39] : memref<104x128xbf16, #tpu.memory_space<vmem>>, vector<24x128xbf16>
    %c2 = arith.constant 2 : index
    %c0_40 = arith.constant 0 : index
    %c0_41 = arith.constant 0 : index
    %38 = vector.load %arg4[%c2, %c0_40, %c0_41] : memref<9x128x128xbf16, #tpu.memory_space<vmem>>, vector<1x128x128xbf16>
    %39 = vector.shape_cast %38 : vector<1x128x128xbf16> to vector<128x128xbf16>
    %cst_42 = arith.constant dense<0.000000e+00> : vector<24x128xf32>
    %40 = tpu.matmul %37, %39, %cst_42 {dimension_numbers = #tpu.dot_dimension_numbers<[1], [0], [0], [1], [0, 0, 1, 1], [], []>} : vector<24x128xbf16>, vector<128x128xbf16>, vector<24x128xf32> -> vector<24x128xf32>
    %41 = arith.addf %36, %40 : vector<24x128xf32>
    %c0_43 = arith.constant 0 : index
    %c0_44 = arith.constant 0 : index
    %c0_45 = arith.constant 0 : index
    %42 = vector.load %arg6[%c0_43, %c0_44, %c0_45] : memref<1x24x128xf32, #tpu.memory_space<vmem>>, vector<1x24x128xf32>
    %43 = vector.shape_cast %42 : vector<1x24x128xf32> to vector<24x128xf32>
    %44 = vector.shape_cast %41 : vector<24x128xf32> to vector<1x24x128xf32>
    tpu.vector_store %arg6[%c0_43, %c0_44, %c0_45], %44 {strides = array<i32>} : memref<1x24x128xf32, #tpu.memory_space<vmem>>, vector<1x24x128xf32>,
    %c0_46 = arith.constant 0 : index
    %c0_47 = arith.constant 0 : index
    %c0_48 = arith.constant 0 : index
    %45 = vector.load %arg6[%c0_46, %c0_47, %c0_48] : memref<1x24x128xf32, #tpu.memory_space<vmem>>, vector<1x24x128xf32>
    %46 = vector.shape_cast %45 : vector<1x24x128xf32> to vector<24x128xf32>
    %c50 = arith.constant 50 : index
    %c0_49 = arith.constant 0 : index
    %47 = vector.load %arg7[%c50, %c0_49] : memref<104x128xbf16, #tpu.memory_space<vmem>>, vector<24x128xbf16>
    %c3 = arith.constant 3 : index
    %c0_50 = arith.constant 0 : index
    %c0_51 = arith.constant 0 : index
    %48 = vector.load %arg4[%c3, %c0_50, %c0_51] : memref<9x128x128xbf16, #tpu.memory_space<vmem>>, vector<1x128x128xbf16>
    %49 = vector.shape_cast %48 : vector<1x128x128xbf16> to vector<128x128xbf16>
    %cst_52 = arith.constant dense<0.000000e+00> : vector<24x128xf32>
    %50 = tpu.matmul %47, %49, %cst_52 {dimension_numbers = #tpu.dot_dimension_numbers<[1], [0], [0], [1], [0, 0, 1, 1], [], []>} : vector<24x128xbf16>, vector<128x128xbf16>, vector<24x128xf32> -> vector<24x128xf32>
    %51 = arith.addf %46, %50 : vector<24x128xf32>
    %c0_53 = arith.constant 0 : index
    %c0_54 = arith.constant 0 : index
    %c0_55 = arith.constant 0 : index
    %52 = vector.load %arg6[%c0_53, %c0_54, %c0_55] : memref<1x24x128xf32, #tpu.memory_space<vmem>>, vector<1x24x128xf32>
    %53 = vector.shape_cast %52 : vector<1x24x128xf32> to vector<24x128xf32>
    %54 = vector.shape_cast %51 : vector<24x128xf32> to vector<1x24x128xf32>
    tpu.vector_store %arg6[%c0_53, %c0_54, %c0_55], %54 {strides = array<i32>} : memref<1x24x128xf32, #tpu.memory_space<vmem>>, vector<1x24x128xf32>,
    %c0_56 = arith.constant 0 : index
    %c0_57 = arith.constant 0 : index
    %c0_58 = arith.constant 0 : index
    %55 = vector.load %arg6[%c0_56, %c0_57, %c0_58] : memref<1x24x128xf32, #tpu.memory_space<vmem>>, vector<1x24x128xf32>
    %56 = vector.shape_cast %55 : vector<1x24x128xf32> to vector<24x128xf32>
    %c75 = arith.constant 75 : index
    %c0_59 = arith.constant 0 : index
    %57 = vector.load %arg7[%c75, %c0_59] : memref<104x128xbf16, #tpu.memory_space<vmem>>, vector<24x128xbf16>
    %c4 = arith.constant 4 : index
    %c0_60 = arith.constant 0 : index
    %c0_61 = arith.constant 0 : index
    %58 = vector.load %arg4[%c4, %c0_60, %c0_61] : memref<9x128x128xbf16, #tpu.memory_space<vmem>>, vector<1x128x128xbf16>
    %59 = vector.shape_cast %58 : vector<1x128x128xbf16> to vector<128x128xbf16>
    %cst_62 = arith.constant dense<0.000000e+00> : vector<24x128xf32>
    %60 = tpu.matmul %57, %59, %cst_62 {dimension_numbers = #tpu.dot_dimension_numbers<[1], [0], [0], [1], [0, 0, 1, 1], [], []>} : vector<24x128xbf16>, vector<128x128xbf16>, vector<24x128xf32> -> vector<24x128xf32>
    %61 = arith.addf %56, %60 : vector<24x128xf32>
    %c0_63 = arith.constant 0 : index
    %c0_64 = arith.constant 0 : index
    %c0_65 = arith.constant 0 : index
    %62 = vector.load %arg6[%c0_63, %c0_64, %c0_65] : memref<1x24x128xf32, #tpu.memory_space<vmem>>, vector<1x24x128xf32>
    %63 = vector.shape_cast %62 : vector<1x24x128xf32> to vector<24x128xf32>
    %64 = vector.shape_cast %61 : vector<24x128xf32> to vector<1x24x128xf32>
    tpu.vector_store %arg6[%c0_63, %c0_64, %c0_65], %64 {strides = array<i32>} : memref<1x24x128xf32, #tpu.memory_space<vmem>>, vector<1x24x128xf32>,
    %c0_66 = arith.constant 0 : index
    %c0_67 = arith.constant 0 : index
    %c0_68 = arith.constant 0 : index
    %65 = vector.load %arg6[%c0_66, %c0_67, %c0_68] : memref<1x24x128xf32, #tpu.memory_space<vmem>>, vector<1x24x128xf32>
    %66 = vector.shape_cast %65 : vector<1x24x128xf32> to vector<24x128xf32>
    %c51 = arith.constant 51 : index
    %c0_69 = arith.constant 0 : index
    %67 = vector.load %arg7[%c51, %c0_69] : memref<104x128xbf16, #tpu.memory_space<vmem>>, vector<24x128xbf16>
    %c5 = arith.constant 5 : index
    %c0_70 = arith.constant 0 : index
    %c0_71 = arith.constant 0 : index
    %68 = vector.load %arg4[%c5, %c0_70, %c0_71] : memref<9x128x128xbf16, #tpu.memory_space<vmem>>, vector<1x128x128xbf16>
    %69 = vector.shape_cast %68 : vector<1x128x128xbf16> to vector<128x128xbf16>
    %cst_72 = arith.constant dense<0.000000e+00> : vector<24x128xf32>
    %70 = tpu.matmul %67, %69, %cst_72 {dimension_numbers = #tpu.dot_dimension_numbers<[1], [0], [0], [1], [0, 0, 1, 1], [], []>} : vector<24x128xbf16>, vector<128x128xbf16>, vector<24x128xf32> -> vector<24x128xf32>
    %71 = arith.addf %66, %70 : vector<24x128xf32>
    %c0_73 = arith.constant 0 : index
    %c0_74 = arith.constant 0 : index
    %c0_75 = arith.constant 0 : index
    %72 = vector.load %arg6[%c0_73, %c0_74, %c0_75] : memref<1x24x128xf32, #tpu.memory_space<vmem>>, vector<1x24x128xf32>
    %73 = vector.shape_cast %72 : vector<1x24x128xf32> to vector<24x128xf32>
    %74 = vector.shape_cast %71 : vector<24x128xf32> to vector<1x24x128xf32>
    tpu.vector_store %arg6[%c0_73, %c0_74, %c0_75], %74 {strides = array<i32>} : memref<1x24x128xf32, #tpu.memory_space<vmem>>, vector<1x24x128xf32>,
    %c0_76 = arith.constant 0 : index
    %c0_77 = arith.constant 0 : index
    %c0_78 = arith.constant 0 : index
    %75 = vector.load %arg6[%c0_76, %c0_77, %c0_78] : memref<1x24x128xf32, #tpu.memory_space<vmem>>, vector<1x24x128xf32>
    %76 = vector.shape_cast %75 : vector<1x24x128xf32> to vector<24x128xf32>
    %c5_79 = arith.constant 5 : index
    %c0_80 = arith.constant 0 : index
    %77 = vector.load %arg7[%c5_79, %c0_80] : memref<104x128xbf16, #tpu.memory_space<vmem>>, vector<24x128xbf16>
    %c6 = arith.constant 6 : index
    %c0_81 = arith.constant 0 : index
    %c0_82 = arith.constant 0 : index
    %78 = vector.load %arg4[%c6, %c0_81, %c0_82] : memref<9x128x128xbf16, #tpu.memory_space<vmem>>, vector<1x128x128xbf16>
    %79 = vector.shape_cast %78 : vector<1x128x128xbf16> to vector<128x128xbf16>
    %cst_83 = arith.constant dense<0.000000e+00> : vector<24x128xf32>
    %80 = tpu.matmul %77, %79, %cst_83 {dimension_numbers = #tpu.dot_dimension_numbers<[1], [0], [0], [1], [0, 0, 1, 1], [], []>} : vector<24x128xbf16>, vector<128x128xbf16>, vector<24x128xf32> -> vector<24x128xf32>
    %81 = arith.addf %76, %80 : vector<24x128xf32>
    %c0_84 = arith.constant 0 : index
    %c0_85 = arith.constant 0 : index
    %c0_86 = arith.constant 0 : index
    %82 = vector.load %arg6[%c0_84, %c0_85, %c0_86] : memref<1x24x128xf32, #tpu.memory_space<vmem>>, vector<1x24x128xf32>
    %83 = vector.shape_cast %82 : vector<1x24x128xf32> to vector<24x128xf32>
    %84 = vector.shape_cast %81 : vector<24x128xf32> to vector<1x24x128xf32>
    tpu.vector_store %arg6[%c0_84, %c0_85, %c0_86], %84 {strides = array<i32>} : memref<1x24x128xf32, #tpu.memory_space<vmem>>, vector<1x24x128xf32>,
    %c0_87 = arith.constant 0 : index
    %c0_88 = arith.constant 0 : index
    %c0_89 = arith.constant 0 : index
    %85 = vector.load %arg6[%c0_87, %c0_88, %c0_89] : memref<1x24x128xf32, #tpu.memory_space<vmem>>, vector<1x24x128xf32>
    %86 = vector.shape_cast %85 : vector<1x24x128xf32> to vector<24x128xf32>
    %c30 = arith.constant 30 : index
    %c0_90 = arith.constant 0 : index
    %87 = vector.load %arg7[%c30, %c0_90] : memref<104x128xbf16, #tpu.memory_space<vmem>>, vector<24x128xbf16>
    %c7 = arith.constant 7 : index
    %c0_91 = arith.constant 0 : index
    %c0_92 = arith.constant 0 : index
    %88 = vector.load %arg4[%c7, %c0_91, %c0_92] : memref<9x128x128xbf16, #tpu.memory_space<vmem>>, vector<1x128x128xbf16>
    %89 = vector.shape_cast %88 : vector<1x128x128xbf16> to vector<128x128xbf16>
    %cst_93 = arith.constant dense<0.000000e+00> : vector<24x128xf32>
    %90 = tpu.matmul %87, %89, %cst_93 {dimension_numbers = #tpu.dot_dimension_numbers<[1], [0], [0], [1], [0, 0, 1, 1], [], []>} : vector<24x128xbf16>, vector<128x128xbf16>, vector<24x128xf32> -> vector<24x128xf32>
    %91 = arith.addf %86, %90 : vector<24x128xf32>
    %c0_94 = arith.constant 0 : index
    %c0_95 = arith.constant 0 : index
    %c0_96 = arith.constant 0 : index
    %92 = vector.load %arg6[%c0_94, %c0_95, %c0_96] : memref<1x24x128xf32, #tpu.memory_space<vmem>>, vector<1x24x128xf32>
    %93 = vector.shape_cast %92 : vector<1x24x128xf32> to vector<24x128xf32>
    %94 = vector.shape_cast %91 : vector<24x128xf32> to vector<1x24x128xf32>
    tpu.vector_store %arg6[%c0_94, %c0_95, %c0_96], %94 {strides = array<i32>} : memref<1x24x128xf32, #tpu.memory_space<vmem>>, vector<1x24x128xf32>,
    %c0_97 = arith.constant 0 : index
    %c0_98 = arith.constant 0 : index
    %c0_99 = arith.constant 0 : index
    %95 = vector.load %arg6[%c0_97, %c0_98, %c0_99] : memref<1x24x128xf32, #tpu.memory_space<vmem>>, vector<1x24x128xf32>
    %96 = vector.shape_cast %95 : vector<1x24x128xf32> to vector<24x128xf32>
    %c6_100 = arith.constant 6 : index
    %c0_101 = arith.constant 0 : index
    %97 = vector.load %arg7[%c6_100, %c0_101] : memref<104x128xbf16, #tpu.memory_space<vmem>>, vector<24x128xbf16>
    %c8 = arith.constant 8 : index
    %c0_102 = arith.constant 0 : index
    %c0_103 = arith.constant 0 : index
    %98 = vector.load %arg4[%c8, %c0_102, %c0_103] : memref<9x128x128xbf16, #tpu.memory_space<vmem>>, vector<1x128x128xbf16>
    %99 = vector.shape_cast %98 : vector<1x128x128xbf16> to vector<128x128xbf16>
    %cst_104 = arith.constant dense<0.000000e+00> : vector<24x128xf32>
    %100 = tpu.matmul %97, %99, %cst_104 {dimension_numbers = #tpu.dot_dimension_numbers<[1], [0], [0], [1], [0, 0, 1, 1], [], []>} : vector<24x128xbf16>, vector<128x128xbf16>, vector<24x128xf32> -> vector<24x128xf32>
    %101 = arith.addf %96, %100 : vector<24x128xf32>
    %c0_105 = arith.constant 0 : index
    %c0_106 = arith.constant 0 : index
    %c0_107 = arith.constant 0 : index
    %102 = vector.load %arg6[%c0_105, %c0_106, %c0_107] : memref<1x24x128xf32, #tpu.memory_space<vmem>>, vector<1x24x128xf32>
    %103 = vector.shape_cast %102 : vector<1x24x128xf32> to vector<24x128xf32>
    %104 = vector.shape_cast %101 : vector<24x128xf32> to vector<1x24x128xf32>
    tpu.vector_store %arg6[%c0_105, %c0_106, %c0_107], %104 {strides = array<i32>} : memref<1x24x128xf32, #tpu.memory_space<vmem>>, vector<1x24x128xf32>,
    %c0_108 = arith.constant 0 : index
    %c0_109 = arith.constant 0 : index
    %c0_110 = arith.constant 0 : index
    %105 = vector.load %arg6[%c0_108, %c0_109, %c0_110] : memref<1x24x128xf32, #tpu.memory_space<vmem>>, vector<1x24x128xf32>
    %106 = vector.shape_cast %105 : vector<1x24x128xf32> to vector<24x128xf32>
    %c0_111 = arith.constant 0 : index
    %c0_112 = arith.constant 0 : index
    %107 = vector.load %arg5[%c0_111, %c0_112] : memref<1x128xf32, #tpu.memory_space<vmem>>, vector<1x128xf32>
    %108 = vector.broadcast %107 : vector<1x128xf32> to vector<24x128xf32>
    %109 = arith.addf %106, %108 : vector<24x128xf32>
    %cst_113 = arith.constant 0.000000e+00 : f32
    %110 = vector.broadcast %cst_113 : f32 to vector<24x128xf32>
    %111 = arith.maximumf %109, %110 : vector<24x128xf32>
    %c0_114 = arith.constant 0 : index
    %c0_115 = arith.constant 0 : index
    %c0_116 = arith.constant 0 : index
    %112 = vector.load %arg6[%c0_114, %c0_115, %c0_116] : memref<1x24x128xf32, #tpu.memory_space<vmem>>, vector<1x24x128xf32>
    %113 = vector.shape_cast %112 : vector<1x24x128xf32> to vector<24x128xf32>
    %114 = vector.shape_cast %111 : vector<24x128xf32> to vector<1x24x128xf32>
    tpu.vector_store %arg6[%c0_114, %c0_115, %c0_116], %114 {strides = array<i32>} : memref<1x24x128xf32, #tpu.memory_space<vmem>>, vector<1x24x128xf32>,
    return
  }
  func.func @transform_0(%arg0: i32) -> (i32, i32, i32) {
    %c0_i32 = arith.constant 0 : i32
    %c0_i32_0 = arith.constant 0 : i32
    %c0_i32_1 = arith.constant 0 : i32
    return %arg0, %c0_i32, %c0_i32_0 : i32, i32, i32
  }
  func.func @transform_1(%arg0: i32) -> (i32, i32) {
    %c0_i32 = arith.constant 0 : i32
    %c0_i32_0 = arith.constant 0 : i32
    %c0_i32_1 = arith.constant 0 : i32
    return %c0_i32, %c0_i32_0 : i32, i32
  }
  func.func @transform_2(%arg0: i32) -> (i32, i32) {
    %c0_i32 = arith.constant 0 : i32
    %c0_i32_0 = arith.constant 0 : i32
    %c0_i32_1 = arith.constant 0 : i32
    return %c0_i32, %c0_i32_0 : i32, i32
  }
  func.func @transform_3(%arg0: i32) -> (i32, i32, i32) {
    %c0_i32 = arith.constant 0 : i32
    %c0_i32_0 = arith.constant 0 : i32
    %c0_i32_1 = arith.constant 0 : i32
    %c0_i32_2 = arith.constant 0 : i32
    return %c0_i32, %c0_i32_0, %c0_i32_1 : i32, i32, i32
  }
  func.func @transform_4(%arg0: i32) -> (i32, i32) {
    %c0_i32 = arith.constant 0 : i32
    %c0_i32_0 = arith.constant 0 : i32
    %c0_i32_1 = arith.constant 0 : i32
    return %c0_i32, %c0_i32_0 : i32, i32
  }
  func.func @transform_5(%arg0: i32) -> (i32, i32, i32) {
    %c0_i32 = arith.constant 0 : i32
    %c0_i32_0 = arith.constant 0 : i32
    %c0_i32_1 = arith.constant 0 : i32
    return %arg0, %c0_i32, %c0_i32_0 : i32, i32, i32
  }
}

</mosaic_0001>

<bundles_post_ra>
// kernel: patch_embed_forward.1
= control target key start
LH: loop header
LB: loop body
LE: loop exit
PB: predicated region body
PF: predicated region fallthrough
CT: control target
= control target key end

     0   :  { %s2718_s18 = smov 0   ;;  %s3044_s0 = inlined_call_operand.vmem [shape: bf16[2,104,128], index: 0, kind: input, shape index: {}]   ;;  %s3045_s1 = inlined_call_operand.vmem [shape: bf16[128,128], index: 1, kind: input, shape index: {}]   ;;  %s3046_s2 = inlined_call_operand.vmem [shape: f32[1,128], index: 2, kind: input, shape index: {}]   ;;  %s3047_s3 = inlined_call_operand.vmem [shape: bf16[9,128,128], index: 3, kind: input, shape index: {}]   ;;  %s3048_s4 = inlined_call_operand.vmem [shape: f32[1,128], index: 4, kind: input, shape index: {}]   ;;  %s3049_s5 = inlined_call_operand.vmem [shape: f32[2,24,128], index: 5, kind: output, shape index: {}]  }
   0x1 LB: > { %s1927_s19 = sadd.s32 4294967295, %s2684_s18   ;;  %p1931_p0 = scmp.ge.s32.totalorder %s2684_s18, 1  ;;  %s2684_s18 = sphi %s2718_s18, %s15_s18  }
   0x2   : > { %p187_p1 = scmp.lt.s32.totalorder %s2684_s18, 3 }
   0x4   : > { %p188_p2 = pnand %p1931_p0, %p187_p1 }
   0x5   : > { %v2573_v0 = vld [vmem:[%s3045_s1] sm:$0xff] (!%p188_p2)   ;;  %v2686_v1 = vmov (!%p188_p2), 0.0   ;;  %v2574_v2 = vld [vmem:[%s3045_s1 + $0x8] sm:$0xff] (!%p188_p2)   ;;  %vm2687_vm0 = vmmov (!%p188_p2), 0   ;;  %p215_p3 = scmp.lt.s32.totalorder (!%p188_p2), %s1927_s19, 1  ;;  %v2575_v3 = vld [vmem:[%s3045_s1 + $0x10] sm:$0xff] (!%p188_p2)  }
   0x6   : > { %191 = sbr.rel (%p188_p2) target bundleno = 626 (0x272), region = 40  ;;  %2337 = vmatprep.subr.bf16.mxu0 (!%p188_p2), %v2686_v1  ;;  %2353 = vmatprep.mubr.msk.bf16.mxu0 (!%p188_p2), %vm2687_vm0, %v2686_v1  ;;  %v2588_v4 = vld [vmem:[%s3047_s3] sm:$0xff] (!%p188_p2)   ;;  %v2576_v5 = vld [vmem:[%s3045_s1 + $0x18] sm:$0xff] (!%p188_p2)   ;;  %v2578_v7 = vld [vmem:[%s3045_s1 + $0x28] sm:$0xff] (!%p188_p2)   ;;  %vm688_vm1 = vsmask.f32 (!%p188_p2), 7424 }
   0x7   : > { %2338 = vmatpush3.bf16.msra.mxu0 (!%p188_p2), %v2573_v0  ;;  %2381 = vmatprep.subr.bf16.mxu1 (!%p188_p2), %v2588_v4  ;;  %v2577_v6 = vld [vmem:[%s3045_s1 + $0x20] sm:$0xff] (!%p188_p2)   ;;  %v2589_v8 = vld [vmem:[%s3047_s3 + $0x8] sm:$0xff] (!%p188_p2)   ;;  %v2579_v9 = vld [vmem:[%s3045_s1 + $0x30] sm:$0xff] (!%p188_p2)   ;;  %vm995_vm2 = vcmask (!%p188_p2), 1046528   ;;  %vm1137_vm3 = vsmask.f32 (!%p188_p2), 6400 }
   0x8   : > { %2339 = vmatprep.subr.bf16.mxu0 (!%p188_p2), %v2686_v1  ;;  %2382 = vmatpush3.bf16.msra.mxu1 (!%p188_p2), %v2588_v4  ;;  %v2580_v10 = vld [vmem:[%s3045_s1 + $0x38] sm:$0xff] (!%p188_p2)   ;;  %v2590_v18 = vld [vmem:[%s3047_s3 + $0x80] sm:$0xff] (!%p188_p2)   ;;  %v2591_v19 = vld [vmem:[%s3047_s3 + $0x10] sm:$0xff] (!%p188_p2)   ;;  %vm1448_vm4 = vsmask.f32 (!%p188_p2), 5376  ;;  %vm1604_vm5 = vcmask (!%p188_p2), 1044480  }
   0x9   : > { %2383 = vmatprep.subr.bf16.mxu1 (!%p188_p2), %v2589_v8  ;;  %v2592_v20 = vld [vmem:[%s3047_s3 + $0x88] sm:$0xff] (!%p188_p2)   ;;  %v2593_v21 = vld [vmem:[%s3047_s3 + $0x18] sm:$0xff] (!%p188_p2)   ;;  %v2594_v22 = vld [vmem:[%s3047_s3 + $0x90] sm:$0xff] (!%p188_p2)  }
   0xa   : > { %v2595_v23 = vld [vmem:[%s3047_s3 + $0x20] sm:$0xff] (!%p188_p2)   ;;  %v2596_v24 = vld [vmem:[%s3047_s3 + $0x98] sm:$0xff] (!%p188_p2)   ;;  %v2597_v25 = vld [vmem:[%s3047_s3 + $0x28] sm:$0xff] (!%p188_p2)  }
   0xb   : > { %2340 = vmatpush3.bf16.msra.mxu0 (!%p188_p2), %v2574_v2  ;;  %v2598_v26 = vld [vmem:[%s3047_s3 + $0xa0] sm:$0xff] (!%p188_p2)   ;;  %v2599_v27 = vld [vmem:[%s3047_s3 + $0x30] sm:$0xff] (!%p188_p2)   ;;  %v2601_v28 = vld [vmem:[%s3047_s3 + $0xa8] sm:$0xff] (!%p188_p2)  }
   0xc   : > { %2341 = vmatprep.subr.bf16.mxu0 (!%p188_p2), %v2686_v1  ;;  %2384 = vmatpush3.bf16.msra.mxu1 (!%p188_p2), %v2589_v8  ;;  %v2602_v29 = vld [vmem:[%s3047_s3 + $0x38] sm:$0xff] (!%p188_p2)   ;;  %v2603_v30 = vld [vmem:[%s3047_s3 + $0xb0] sm:$0xff] (!%p188_p2)   ;;  %v2604_v31 = vld [vmem:[%s3047_s3 + $0x40] sm:$0xff] (!%p188_p2)  }
   0xd   : > { %s3051_s19 = smov (!%p215_p3, %s1927_s19), 1  ;;  %2385 = vmatprep.subr.bf16.mxu1 %v2591_v19  ;;  %v2606_v32 = vld [vmem:[%s3047_s3 + $0xb8] sm:$0xff]   ;;  %v2826_v33 = vld [vmem:[%s3047_s3 + $0x100] sm:$0xff]  }
   0xe   : > { %s2561_s26 = smul.u32 52, %s3051_s19  ;;  %v2832_v34 = vld [vmem:[%s3046_s2] ss:$0 sm:$0xff] }
   0xf   : > { %2342 = vmatpush3.bf16.msra.mxu0 %v2575_v3  ;;  %v2607_v3 = vld [vmem:[%s3047_s3 + $0x48] sm:$0xff]   ;;  %s2562_s25 = smul.u32 24, %s3051_s19 }
  0x10   : > { %s2742_s29 = scalar_lea.vmem %s3044_s0, %s2561_s26  ;;  %2343 = vmatprep.subr.bf16.mxu0 %v2686_v1  ;;  %2386 = vmatpush3.bf16.msra.mxu1 %v2591_v19 }
  0x11   : > { %v2581_v11 = vld [vmem:[%s2742_s29] sm:$0xff]   ;;  %v2582_v12 = vld [vmem:[%s2742_s29 + $0x8] sm:$0xff]   ;;  %v2583_v13 = vld [vmem:[%s2742_s29 + $0x10] sm:$0xff]   ;;  %2387 = vmatprep.subr.bf16.mxu1 %v2593_v21  ;;  %s224_s30 = scalar_lea.vmem %s3049_s5, %s2562_s25 }
  0x12   : > { %v2584_v14 = vld [vmem:[%s2742_s29 + $0x18] sm:$0xff]   ;;  %v2585_v15 = vld [vmem:[%s2742_s29 + $0x20] sm:$0xff]   ;;  %v2586_v16 = vld [vmem:[%s2742_s29 + $0x28] sm:$0xff]  }
  0x13   : > { %2344 = vmatpush3.bf16.msra.mxu0 %v2576_v5  ;;  %v2587_v17 = vld [vmem:[%s2742_s29 + $0x30] ss:$0 sps:$4 sm:$0xff]  }
  0x14   : > { %2345 = vmatprep.subr.bf16.mxu0 %v2686_v1  ;;  %2388 = vmatpush3.bf16.msra.mxu1 %v2593_v21  ;;  %v2614_v21 = vld [vmem:[%s3047_s3 + $0x108] sm:$0xff]  }
  0x15   : > { %2389 = vmatprep.subr.bf16.mxu1 %v2595_v23 }
  0x17   : > { %2346 = vmatpush3.bf16.msra.mxu0 %v2577_v6 }
  0x18   : > { %2347 = vmatprep.subr.bf16.mxu0 %v2686_v1  ;;  %2390 = vmatpush3.bf16.msra.mxu1 %v2595_v23 }
  0x19   : > { %2391 = vmatprep.subr.bf16.mxu1 %v2597_v25 }
  0x1b   : > { %2348 = vmatpush3.bf16.msra.mxu0 %v2578_v7 }
  0x1c   : > { %2349 = vmatprep.subr.bf16.mxu0 %v2686_v1  ;;  %2392 = vmatpush3.bf16.msra.mxu1 %v2597_v25 }
  0x1d   : > { %2393 = vmatprep.subr.bf16.mxu1 %v2599_v27 }
  0x1f   : > { %2350 = vmatpush3.bf16.msra.mxu0 %v2579_v9 }
  0x20   : > { %2351 = vmatprep.subr.bf16.mxu0 %v2686_v1  ;;  %2394 = vmatpush3.bf16.msra.mxu1 %v2599_v27 }
  0x21   : > { %2395 = vmatprep.subr.bf16.mxu1 %v2602_v29 }
  0x23   : > { %2352 = vmatpush3.bf16.msra.mxu0 %v2580_v10 }
  0x24   : > { %2421 = vmatprep.subr.bf16.mxu0 %v2590_v18  ;;  %2396 = vmatpush3.bf16.msra.mxu1 %v2602_v29 }
  0x25   : > { %2401 = vmatprep.subr.bf16.mxu1 %v2604_v31 }
  0x26   : > { %2354 = vmatmul.mubr.bf16.vlgmr.msra.gmra.mrb[0].mxu0 %v2581_v11 }
  0x27   : > { %2357 = vmatprep.mubr.msk.bf16.mxu0 %vm2687_vm0, %v2686_v1  ;;  %2422 = vmatpush3.bf16.msra.mxu0 %v2590_v18 }
  0x28   : > { %2423 = vmatprep.subr.bf16.mxu0 %v2592_v20 }
  0x2b   : > { %2424 = vmatpush3.bf16.msra.mxu0 %v2592_v20  ;;  %v2611_v20 = vld [vmem:[%s3047_s3 + $0x58] sm:$0xff]  }
  0x2c   : > { %2425 = vmatprep.subr.bf16.mxu0 %v2594_v22 }
  0x2e   : > { %2358 = vmatmul.mubr.bf16.gmra.mrb[4].mxu0 %v2582_v12 }
  0x2f   : > { %2361 = vmatprep.mubr.msk.bf16.mxu0 %vm2687_vm0, %v2686_v1  ;;  %2426 = vmatpush3.bf16.msra.mxu0 %v2594_v22 }
  0x30   : > { %2427 = vmatprep.subr.bf16.mxu0 %v2596_v24 }
  0x33   : > { %2428 = vmatpush3.bf16.msra.mxu0 %v2596_v24 }
  0x34   : > { %2429 = vmatprep.subr.bf16.mxu0 %v2598_v26 }
  0x36   : > { %2362 = vmatmul.mubr.bf16.gmra.mrb[8].mxu0 %v2583_v13 }
  0x37   : > { %2365 = vmatprep.mubr.msk.bf16.mxu0 %vm2687_vm0, %v2686_v1  ;;  %2430 = vmatpush3.bf16.msra.mxu0 %v2598_v26 }
  0x38   : > { %2431 = vmatprep.subr.bf16.mxu0 %v2601_v28 }
  0x3b   : > { %2432 = vmatpush3.bf16.msra.mxu0 %v2601_v28 }
  0x3c   : > { %2433 = vmatprep.subr.bf16.mxu0 %v2603_v30 }
  0x3e   : > { %2366 = vmatmul.mubr.bf16.gmra.mrb[12].mxu0 %v2584_v14  ;;  %v2610_v14 = vld [vmem:[%s3047_s3 + $0x50] sm:$0xff]  }
  0x3f   : > { %2369 = vmatprep.mubr.msk.bf16.mxu0 %vm2687_vm0, %v2686_v1  ;;  %2434 = vmatpush3.bf16.msra.mxu0 %v2603_v30 }
  0x40   : > { %2435 = vmatprep.subr.bf16.mxu0 %v2606_v32 }
  0x43   : > { %2436 = vmatpush3.bf16.msra.mxu0 %v2606_v32  ;;  %v2613_v32 = vld [vmem:[%s3047_s3 + $0x60] sm:$0xff]  }
  0x44   : > { %2461 = vmatprep.subr.bf16.mxu0 %v2826_v33 }
  0x46   : > { %2370 = vmatmul.mubr.bf16.gmra.mrb[16].mxu0 %v2585_v15 }
  0x47   : > { %2373 = vmatprep.mubr.msk.bf16.mxu0 %vm2687_vm0, %v2686_v1 }
  0x4e   : > { %2374 = vmatmul.mubr.bf16.gmra.mrb[20].mxu0 %v2586_v16 }
  0x4f   : > { %2377 = vmatprep.mubr.msk.bf16.mxu0 %vm2687_vm0, %v2686_v1 }
  0x56   : > { %2378 = vmatmul.mubr.bf16.gmra.mrb[24].mxu0 %v2587_v17 }
  0xf9   : > { %v384_v35 = vpop.f32.mrb[0].mxu0 }
  0xfa   : > { %v385_v36 = vadd.f32 %v2832_v34, %v384_v35  ;;  %v2355_v37 = vpop.f32.mrb[1].mxu0 }
  0xfb   : > { %v387_v38 = vpop.f32.mrb[2].mxu0 }
  0xfc   : > { %v388_v39 = vadd.f32 %v2832_v34, %v387_v38  ;;  %v2356_v40 = vpop.f32.mrb[3].mxu0  ;;  %v438_v41 = vmax.f32 %v385_v36, 0.0  ;;  %v2618_v36 = vld [vmem:[%s3047_s3 + $0x110] sm:$0xff]  }
  0xfe   : > { %v439_v42 = vmax.f32 %v388_v39, 0.0  ;;  %v2620_v39 = vld [vmem:[%s3047_s3 + $0x118] sm:$0xff]  }
 0x100   : > { %v2200_v43 = vpack.c.bf16 %v439_v42, %v438_v41 }
 0x101   : > { %v392_v44 = vpop.f32.mrb[4].mxu0 }
 0x102   : > { %2201 = vst [vmem:[#allocation2] sm:$0xff] %v2200_v43   ;;  %v393_v45 = vadd.f32 %v2832_v34, %v392_v44  ;;  %v2359_v46 = vpop.f32.mrb[5].mxu0 }
 0x103   : > { %v395_v47 = vpop.f32.mrb[6].mxu0 }
 0x104   : > { %v396_v48 = vadd.f32 %v2832_v34, %v395_v47  ;;  %v2360_v49 = vpop.f32.mrb[7].mxu0  ;;  %v440_v50 = vmax.f32 %v393_v45, 0.0 }
 0x106   : > { %v441_v51 = vmax.f32 %v396_v48, 0.0 }
 0x108   : > { %v2205_v52 = vpack.c.bf16 %v441_v51, %v440_v50 }
 0x109   : > { %v400_v53 = vpop.f32.mrb[8].mxu0  ;;  %v2600_v54 = vld [vmem:[#allocation2] sm:$0xff]  }
 0x10a   : > { %2227 = vst [vmem:[#allocation2 + $0x8] sm:$0xff] %v2205_v52   ;;  %v401_v55 = vadd.f32 %v2832_v34, %v400_v53  ;;  %v2363_v56 = vpop.f32.mrb[9].mxu0  ;;  %2397 = vmatprep.mubr.bf16.mxu1 %v2600_v54  ;;  %v2608_v58 = vld [vmem:[#allocation2] sm:$0xff]   ;;  %v2619_v53 = vld [vmem:[%s3047_s3 + $0x70] sm:$0xff]  }
 0x10b   : > { %v403_v57 = vpop.f32.mrb[10].mxu0  ;;  %v845_v63 = vshll.u32 %v2608_v58, 16  ;;  %v843_v12 = vshrl.u32 %v2608_v58, 16 }
 0x10c   : > { %v442_v59 = vmax.f32 %v401_v55, 0.0  ;;  %v404_v60 = vadd.f32 %v2832_v34, %v403_v57  ;;  %v2364_v61 = vpop.f32.mrb[11].mxu0  ;;  %v2622_v55 = vld [vmem:[%s3047_s3 + $0x120] sm:$0xff]  }
 0x10d   : > { %v847_v8 = vrot.slane %v845_v63, 1  ;;  %v2626_v63 = vld [vmem:[%s3047_s3 + $0x128] sm:$0xff]  }
 0x10e   : > { %v443_v62 = vmax.f32 %v404_v60, 0.0 }
 0x10f   : > { %v848_v16 = vor.u32 %v847_v8, %v843_v12 }
 0x110   : > { %v2210_v0 = vpack.c.bf16 %v443_v62, %v442_v59  ;;  %v2621_v59 = vld [vmem:[%s3047_s3 + $0x78] sm:$0xff]  }
 0x111   : > { %v408_v1 = vpop.f32.mrb[12].mxu0  ;;  %v2605_v2 = vld [vmem:[#allocation2 + $0x8] ss:$0 sps:$4 sm:$0xff]  }
 0x112   : > { %2228 = vst [vmem:[#allocation2 + $0x10] sm:$0xff] %v2210_v0   ;;  %v409_v4 = vadd.f32 %v2832_v34, %v408_v1  ;;  %v2367_v5 = vpop.f32.mrb[13].mxu0  ;;  %2398 = vmatmul.mubr.bf16.vlgmr.msra.gmra.mrb[0].mxu1 %v2605_v2  ;;  %v2609_v7 = vld [vmem:[#allocation2 + $0x8] sm:$0x1f]  }
 0x113   : > { %v411_v6 = vpop.f32.mrb[14].mxu0  ;;  %2402 = vmatpush3.bf16.msra.mxu1 %v2604_v31  ;;  %v850_v13 = vshll.u32 %v2609_v7, 16  ;;  %v854_v18 = vshrl.u32 %v2609_v7, 16 }
 0x114   : > { %v444_v9 = vmax.f32 %v409_v4, 0.0  ;;  %v412_v10 = vadd.f32 %v2832_v34, %v411_v6  ;;  %v2368_v11 = vpop.f32.mrb[15].mxu0  ;;  %2403 = vmatprep.subr.bf16.mxu1 %v2607_v3  ;;  %v2623_v4 = vld [vmem:[%s3047_s3 + $0xc0] sm:$0xff]  }
 0x115   : > { %v852_v17 = vrot.slane %v850_v13, 1  ;;  %v2630_v13 = vld [vmem:[%s3047_s3 + $0x138] sm:$0xff]  }
 0x116   : > { %v445_v15 = vmax.f32 %v412_v10, 0.0  ;;  %v2637_v10 = vld [vmem:[#allocation2 + $0x8] sm:$0x7f]  }
 0x117   : > { %2404 = vmatpush3.bf16.msra.mxu1 %v2607_v3  ;;  %v853_v23 = vsel %vm688_vm1, %v848_v16, %v852_v17  ;;  %v856_v24 = vor.u32 %v854_v18, %v852_v17  ;;  %v2629_v18 = vld [vmem:[%s3047_s3 + $0xd0] sm:$0xff]  }
 0x118   : > { %v2215_v19 = vpack.c.bf16 %v445_v15, %v444_v9  ;;  %2405 = vmatprep.subr.bf16.mxu1 %v2610_v14  ;;  %2437 = vmatprep.mubr.bf16.mxu0 %v853_v23  ;;  %v2627_v9 = vld [vmem:[%s3047_s3 + $0xc8] sm:$0xff]  }
 0x119   : > { %v416_v22 = vpop.f32.mrb[16].mxu0  ;;  %v2616_v25 = vld [vmem:[#allocation2 + $0xc] sm:$0xff]   ;;  %2438 = vmatmul.mubr.bf16.vlgmr.msra.gmra.mrb[28].mxu0 %v856_v24 }
 0x11a   : > { %2229 = vst [vmem:[#allocation2 + $0x18] sm:$0xff] %v2215_v19   ;;  %v417_v26 = vadd.f32 %v2832_v34, %v416_v22  ;;  %v2371_v27 = vpop.f32.mrb[17].mxu0  ;;  %2462 = vmatpush3.bf16.msra.mxu0 %v2826_v33  ;;  %v692_v35 = vshll.u32 %v2616_v25, 16  ;;  %v2615_v33 = vld [vmem:[%s3047_s3 + $0x68] sm:$0xff]   ;;  %v690_v46 = vshrl.u32 %v2616_v25, 16  ;;  %v1458_v19 = vshrl.u32 %v2637_v10, 16 }
 0x11b   : > { %v419_v28 = vpop.f32.mrb[18].mxu0  ;;  %2406 = vmatpush3.bf16.msra.mxu1 %v2610_v14  ;;  %2463 = vmatprep.subr.bf16.mxu0 %v2614_v21  ;;  %v2636_v14 = vld [vmem:[#allocation2] sm:$0xfc]   ;;  %v2631_v27 = vld [vmem:[%s3047_s3 + $0xd8] sm:$0xff]  }
 0x11c   : > { %v446_v29 = vmax.f32 %v417_v26, 0.0  ;;  %v420_v30 = vadd.f32 %v2832_v34, %v419_v28  ;;  %v2372_v31 = vpop.f32.mrb[19].mxu0  ;;  %2407 = vmatprep.subr.bf16.mxu1 %v2611_v20  ;;  %v694_v42 = vrot.slane %v692_v35, 1  ;;  %v1450_v22 = vshrl.u32 %v2636_v14, 16 }
 0x11d   : > { %v1453_v23 = vshll.u32 %v2636_v14, 16  ;;  %v2659_v14 = vld [vmem:[%s3047_s3 + $0x168] sm:$0xff]  }
 0x11e   : > { %v447_v37 = vmax.f32 %v420_v30, 0.0  ;;  %2464 = vmatpush3.bf16.msra.mxu0 %v2614_v21  ;;  %v695_v51 = vor.u32 %v694_v42, %v690_v46  ;;  %v2634_v21 = vld [vmem:[%s3047_s3 + $0x180] sm:$0xff]   ;;  %v1460_v30 = vrot.slane %v1458_v19, 2  ;;  %v2640_v46 = vld [vmem:[%s3047_s3 + $0x190] sm:$0xff]  }
 0x11f   : > { %2408 = vmatpush3.bf16.msra.mxu1 %v2611_v20  ;;  %2465 = vmatprep.subr.bf16.mxu0 %v2618_v36  ;;  %v1461_v20 = vshll.u32 %v2637_v10, 16  ;;  %v2657_v10 = vld [vmem:[%s3047_s3 + $0x160] sm:$0xff]  }
 0x120   : > { %v2220_v38 = vpack.c.bf16 %v447_v37, %v446_v29  ;;  %2409 = vmatprep.subr.bf16.mxu1 %v2613_v32  ;;  %v2664_v19 = vld [vmem:[%s3047_s3 + $0x220] sm:$0xff]  }
 0x121   : > { %v424_v40 = vpop.f32.mrb[20].mxu0  ;;  %v2617_v41 = vld [vmem:[#allocation2 + $0x14] sm:$0x1f]   ;;  %v2624_v60 = vld [vmem:[#allocation2 + $0x18] sm:$0xfe]   ;;  %v1463_v31 = vrot.slane %v1461_v20, 3 }
 0x122   : > { %2230 = vst [vmem:[#allocation2 + $0x20] sm:$0xff] %v2220_v38   ;;  %v425_v43 = vadd.f32 %v2832_v34, %v424_v40  ;;  %v2375_v44 = vpop.f32.mrb[21].mxu0  ;;  %v697_v47 = vshll.u32 %v2617_v41, 16  ;;  %2466 = vmatpush3.bf16.msra.mxu0 %v2618_v36  ;;  %v701_v6 = vshrl.u32 %v2617_v41, 16  ;;  %v996_v7 = vrot.slane %v2624_v60, 1 }
 0x123   : > { %v427_v45 = vpop.f32.mrb[22].mxu0  ;;  %2410 = vmatpush3.bf16.msra.mxu1 %v2613_v32  ;;  %2467 = vmatprep.subr.bf16.mxu0 %v2620_v39  ;;  %v1452_v32 = vrot.slane %v1450_v22, 2  ;;  %v1455_v38 = vrot.slane %v1453_v23, 3  ;;  %v2915_v40 = vor.u32 %v1463_v31, %v1460_v30  ;;  %v2667_v20 = vld [vmem:[#allocation2 + $0x14] sm:$0x7f]  }
 0x124   : > { %v448_v48 = vmax.f32 %v425_v43, 0.0  ;;  %v428_v49 = vadd.f32 %v2832_v34, %v427_v45  ;;  %v2376_v50 = vpop.f32.mrb[23].mxu0  ;;  %2411 = vmatprep.subr.bf16.mxu1 %v2615_v33  ;;  %v699_v52 = vrot.slane %v697_v47, 1  ;;  %v2638_v43 = vld [vmem:[%s3047_s3 + $0x188] sm:$0xff]   ;;  %v2646_v47 = vld [vmem:[#allocation2 + $0x18] sm:$0xfe]  }
 0x125   : > { %v1456_v42 = vor.u32 %v1455_v38, %v1452_v32  ;;  %v2639_v45 = vld [vmem:[%s3047_s3 + $0xe8] sm:$0xff]   ;;  %v2642_v50 = vld [vmem:[%s3047_s3 + $0x198] sm:$0xff]   ;;  %v1606_v23 = vrot.slane %v2667_v20, 3  ;;  %v2674_v32 = vld [vmem:[%s3047_s3 + $0x1e0] sm:$0xff]  }
 0x126   : > { %v449_v54 = vmax.f32 %v428_v49, 0.0  ;;  %v700_v56 = vsel %vm688_vm1, %v695_v51, %v699_v52  ;;  %2468 = vmatpush3.bf16.msra.mxu0 %v2620_v39  ;;  %v703_v11 = vor.u32 %v701_v6, %v699_v52  ;;  %v2635_v39 = vld [vmem:[%s3047_s3 + $0xe0] sm:$0xff]   ;;  %v2641_v49 = vld [vmem:[%s3047_s3 + $0xf0] sm:$0xff]   ;;  %v1294_v51 = vshrl.u32 %v2646_v47, 16  ;;  %v2967_v6 = vld [vmem:[#allocation2 + $0x8] sm:$0x7f]  }
 0x127   : > { %2412 = vmatpush3.bf16.msra.mxu1 %v2615_v33  ;;  %2417 = vmatprep.mubr.bf16.mxu1 %v700_v56  ;;  %v1465_v44 = vsel %vm1448_vm4, %v1456_v42, %v2915_v40  ;;  %v1297_v52 = vshll.u32 %v2646_v47, 16  ;;  %v2644_v56 = vld [vmem:[%s3047_s3 + $0x1a0] sm:$0xff]   ;;  %v2666_v22 = vld [vmem:[#allocation2 + $0xc] sm:$0xf8]   ;;  %v2672_v30 = vld [vmem:[%s3047_s3 + $0x238] sm:$0xff]  }
 0x128   : > { %v2225_v57 = vpack.c.bf16 %v449_v54, %v448_v48  ;;  %2413 = vmatprep.subr.bf16.mxu1 %v2619_v53  ;;  %2469 = vmatprep.subr.bf16.mxu0 %v2622_v55  ;;  %v2673_v31 = vld [vmem:[%s3047_s3 + $0x1d8] sm:$0xff]  }
 0x129   : > { %v432_v58 = vpop.f32.mrb[24].mxu0  ;;  %v2883_v62 = vld [vmem:[#allocation2 + $0x20] sm:$0x1f]  }
 0x12a   : > { %2231 = vst [vmem:[#allocation2 + $0x28] sm:$0xff] %v2225_v57   ;;  %v433_v61 = vadd.f32 %v2832_v34, %v432_v58  ;;  %v2379_v0 = vpop.f32.mrb[25].mxu0  ;;  %2470 = vmatpush3.bf16.msra.mxu0 %v2622_v55  ;;  %v2628_v34 = vld [vmem:[%s3047_s3 + $0x130] sm:$0xff]   ;;  %v997_v8 = vrot.slane %v2883_v62, 1  ;;  %v2647_v48 = vld [vmem:[#allocation2 + $0x20] sm:$0x3f]  }
 0x12b   : > { %v435_v1 = vpop.f32.mrb[26].mxu0  ;;  %2414 = vmatpush3.bf16.msra.mxu1 %v2619_v53  ;;  %2471 = vmatprep.subr.bf16.mxu0 %v2626_v63  ;;  %v1302_v53 = vshrl.u32 %v2647_v48, 16  ;;  %v1305_v54 = vshll.u32 %v2647_v48, 16  ;;  %v2643_v55 = vld [vmem:[%s3047_s3 + $0xf8] sm:$0xff]   ;;  %v1296_v57 = vrot.slane %v1294_v51, 1  ;;  %v1299_v58 = vrot.slane %v1297_v52, 2 }
 0x12c   : > { %v450_v2 = vmax.f32 %v433_v61, 0.0  ;;  %v2380_v3 = vpop.f32.mrb[27].mxu0  ;;  %2415 = vmatprep.subr.bf16.mxu1 %v2621_v59  ;;  %v998_v15 = vsel %vm995_vm2, %v996_v7, %v997_v8  ;;  %v2645_v61 = vld [vmem:[%s3047_s3 + $0x140] sm:$0xff]   ;;  %v2648_v1 = vld [vmem:[%s3047_s3 + $0x1a8] sm:$0xff]   ;;  %v2652_v62 = vld [vmem:[%s3047_s3 + $0x1b8] sm:$0xff]  }
 0x12d   : > { %v1307_v60 = vrot.slane %v1305_v54, 2  ;;  %v2654_v7 = vld [vmem:[%s3047_s3 + $0x200] sm:$0xff]  }
 0x12e   : > { %v2196_v5 = vpack.c.bf16 %v450_v2, %v450_v2  ;;  %2472 = vmatpush3.bf16.msra.mxu0 %v2626_v63  ;;  %v1300_v63 = vor.u32 %v1299_v58, %v1296_v57  ;;  %v2649_v2 = vld [vmem:[%s3047_s3 + $0x148] sm:$0xff]  }
 0x12f   : > { %2416 = vmatpush3.bf16.msra.mxu1 %v2621_v59  ;;  %2473 = vmatprep.subr.bf16.mxu0 %v2628_v34  ;;  %v1304_v59 = vrot.slane %v1302_v53, 1 }
 0x130   : > { %516 = vst [vmem:[#allocation2 + $0x30] sm:$0xf] %v2196_v5  ;;  %2441 = vmatprep.subr.bf16.mxu1 %v2623_v4  ;;  %v2651_v5 = vld [vmem:[%s3047_s3 + $0x150] sm:$0xff]  }
 0x131   : > { %v2632_v12 = vld [vmem:[#allocation2 + $0x24] sm:$0xfe]   ;;  %v2943_v0 = vor.u32 %v1307_v60, %v1304_v59 }
 0x132   : > { %2418 = vmatmul.mubr.bf16.vlgmr.msra.gmra.mrb[4].mxu1 %v703_v11  ;;  %v1139_v16 = vshrl.u32 %v2632_v12, 16  ;;  %v1142_v17 = vshll.u32 %v2632_v12, 16  ;;  %2474 = vmatpush3.bf16.msra.mxu0 %v2628_v34  ;;  %v2653_v34 = vld [vmem:[%s3047_s3 + $0x158] sm:$0xff]   ;;  %v2658_v12 = vld [vmem:[%s3047_s3 + $0x208] sm:$0xff]  }
 0x133   : > { %2442 = vmatpush3.bf16.msra.mxu1 %v2623_v4  ;;  %2457 = vmatprep.mubr.bf16.mxu1 %v998_v15  ;;  %v1309_v3 = vsel %vm1137_vm3, %v1300_v63, %v2943_v0  ;;  %v2650_v4 = vld [vmem:[%s3047_s3 + $0x1b0] sm:$0xff]  }
 0x134   : > { %2443 = vmatprep.subr.bf16.mxu1 %v2627_v9  ;;  %2475 = vmatprep.subr.bf16.mxu0 %v2630_v13  ;;  %v1141_v25 = vrot.slane %v1139_v16, 1  ;;  %v1144_v26 = vrot.slane %v1142_v17, 2  ;;  %v2660_v15 = vld [vmem:[%s3047_s3 + $0x210] sm:$0xff]   ;;  %v2662_v17 = vld [vmem:[%s3047_s3 + $0x218] sm:$0xff]  }
 0x135   : > { %v2661_v16 = vld [vmem:[%s3047_s3 + $0x170] sm:$0xff]  }
 0x136   : > { %2476 = vmatpush3.bf16.msra.mxu0 %v2630_v13  ;;  %v1145_v35 = vor.u32 %v1144_v26, %v1141_v25  ;;  %v1605_v25 = vrot.slane %v2666_v22, 3  ;;  %v2669_v26 = vld [vmem:[%s3047_s3 + $0x1c8] sm:$0xff]  }
 0x137   : > { %v2633_v24 = vld [vmem:[#allocation2 + $0x2c] sm:$0x3f]   ;;  %2444 = vmatpush3.bf16.msra.mxu1 %v2627_v9  ;;  %2501 = vmatprep.subr.bf16.mxu0 %v2634_v21  ;;  %v1747_v9 = vrot.slane %v2967_v6, 3 }
 0x138   : > { %2445 = vmatprep.subr.bf16.mxu1 %v2629_v18  ;;  %v1147_v28 = vshrl.u32 %v2633_v24, 16  ;;  %v1150_v29 = vshll.u32 %v2633_v24, 16  ;;  %v2668_v24 = vld [vmem:[%s3047_s3 + $0x228] sm:$0xff]  }
 0x13a   : > { %v1149_v36 = vrot.slane %v1147_v28, 1  ;;  %v1152_v37 = vrot.slane %v1150_v29, 2  ;;  %v2670_v28 = vld [vmem:[%s3047_s3 + $0x230] sm:$0xff]  }
 0x13b   : > { %2446 = vmatpush3.bf16.msra.mxu1 %v2629_v18  ;;  %v2663_v18 = vld [vmem:[%s3047_s3 + $0x178] sm:$0xff]   ;;  %v2671_v29 = vld [vmem:[%s3047_s3 + $0x1d0] sm:$0xff]  }
 0x13c   : > { %2447 = vmatprep.subr.bf16.mxu1 %v2631_v27  ;;  %v1153_v33 = vor.u32 %v1152_v37, %v1149_v36  ;;  %v2676_v36 = vld [vmem:[%s3047_s3 + $0x1f0] sm:$0xff]   ;;  %v2677_v37 = vld [vmem:[%s3047_s3 + $0x1f8] sm:$0xff]  }
 0x13e   : > { %v1154_v41 = vsel %vm1137_vm3, %v1145_v35, %v1153_v33  ;;  %v2675_v35 = vld [vmem:[%s3047_s3 + $0x1e8] sm:$0xff]  }
 0x13f   : > { %2448 = vmatpush3.bf16.msra.mxu1 %v2631_v27  ;;  %2477 = vmatprep.mubr.bf16.mxu0 %v1154_v41  ;;  %v1607_v27 = vsel %vm1604_vm5, %v1605_v25, %v1606_v23  ;;  %v2181_v25 = vld [vmem:[%s3048_s4] ss:$0 sm:$0xff] }
 0x140   : > { %2478 = vmatmul.mubr.bf16.vlgmr.msra.gmra.mrb[32].mxu0 %v1153_v33  ;;  %2449 = vmatprep.subr.bf16.mxu1 %v2635_v39 }
 0x141   : > { %2502 = vmatpush3.bf16.msra.mxu0 %v2634_v21  ;;  %2517 = vmatprep.mubr.bf16.mxu0 %v1465_v44  ;;  %v2665_v21 = vld [vmem:[%s3047_s3 + $0x1c0] sm:$0xff]  }
 0x142   : > { %2503 = vmatprep.subr.bf16.mxu0 %v2638_v43 }
 0x143   : > { %2450 = vmatpush3.bf16.msra.mxu1 %v2635_v39 }
 0x144   : > { %2451 = vmatprep.subr.bf16.mxu1 %v2639_v45 }
 0x145   : > { %2504 = vmatpush3.bf16.msra.mxu0 %v2638_v43 }
 0x146   : > { %2505 = vmatprep.subr.bf16.mxu0 %v2640_v46 }
 0x147   : > { %2452 = vmatpush3.bf16.msra.mxu1 %v2639_v45 }
 0x148   : > { %2453 = vmatprep.subr.bf16.mxu1 %v2641_v49 }
 0x149   : > { %2506 = vmatpush3.bf16.msra.mxu0 %v2640_v46 }
 0x14a   : > { %2507 = vmatprep.subr.bf16.mxu0 %v2642_v50 }
 0x14b   : > { %2454 = vmatpush3.bf16.msra.mxu1 %v2641_v49 }
 0x14c   : > { %2455 = vmatprep.subr.bf16.mxu1 %v2643_v55 }
 0x14d   : > { %2508 = vmatpush3.bf16.msra.mxu0 %v2642_v50 }
 0x14e   : > { %2509 = vmatprep.subr.bf16.mxu0 %v2644_v56 }
 0x14f   : > { %2456 = vmatpush3.bf16.msra.mxu1 %v2643_v55 }
 0x150   : > { %2481 = vmatprep.subr.bf16.mxu1 %v2645_v61 }
 0x151   : > { %2510 = vmatpush3.bf16.msra.mxu0 %v2644_v56 }
 0x152   : > { %2458 = vmatmul.mubr.bf16.vlgmr.msra.gmra.mrb[8].mxu1 %v997_v8  ;;  %2511 = vmatprep.subr.bf16.mxu0 %v2648_v1  ;;  %v2655_v8 = vld [vmem:[#allocation2] sm:$0xf8]  }
 0x153   : > { %2482 = vmatpush3.bf16.msra.mxu1 %v2645_v61  ;;  %2497 = vmatprep.mubr.bf16.mxu1 %v1309_v3  ;;  %v1746_v11 = vrot.slane %v2655_v8, 3 }
 0x154   : > { %2483 = vmatprep.subr.bf16.mxu1 %v2649_v2 }
 0x155   : > { %2512 = vmatpush3.bf16.msra.mxu0 %v2648_v1  ;;  %v1748_v13 = vsel %vm1604_vm5, %v1746_v11, %v1747_v9 }
 0x156   : > { %2513 = vmatprep.subr.bf16.mxu0 %v2650_v4 }
 0x157   : > { %2484 = vmatpush3.bf16.msra.mxu1 %v2649_v2 }
 0x158   : > { %2485 = vmatprep.subr.bf16.mxu1 %v2651_v5 }
 0x159   : > { %2514 = vmatpush3.bf16.msra.mxu0 %v2650_v4 }
 0x15a   : > { %2515 = vmatprep.subr.bf16.mxu0 %v2652_v62 }
 0x15b   : > { %2486 = vmatpush3.bf16.msra.mxu1 %v2651_v5 }
 0x15c   : > { %2487 = vmatprep.subr.bf16.mxu1 %v2653_v34 }
 0x15d   : > { %2516 = vmatpush3.bf16.msra.mxu0 %v2652_v62 }
 0x15e   : > { %2541 = vmatprep.subr.bf16.mxu0 %v2654_v7 }
 0x15f   : > { %2488 = vmatpush3.bf16.msra.mxu1 %v2653_v34 }
 0x160   : > { %2518 = vmatmul.mubr.bf16.vlgmr.msra.gmra.mrb[36].mxu0 %v2915_v40  ;;  %2489 = vmatprep.subr.bf16.mxu1 %v2657_v10 }
 0x161   : > { %2542 = vmatpush3.bf16.msra.mxu0 %v2654_v7  ;;  %2557 = vmatprep.mubr.bf16.mxu0 %v1748_v13 }
 0x162   : > { %2543 = vmatprep.subr.bf16.mxu0 %v2658_v12 }
 0x163   : > { %2490 = vmatpush3.bf16.msra.mxu1 %v2657_v10 }
 0x164   : > { %2491 = vmatprep.subr.bf16.mxu1 %v2659_v14 }
 0x165   : > { %2544 = vmatpush3.bf16.msra.mxu0 %v2658_v12 }
 0x166   : > { %2545 = vmatprep.subr.bf16.mxu0 %v2660_v15 }
 0x167   : > { %2492 = vmatpush3.bf16.msra.mxu1 %v2659_v14 }
 0x168   : > { %2493 = vmatprep.subr.bf16.mxu1 %v2661_v16 }
 0x169   : > { %2546 = vmatpush3.bf16.msra.mxu0 %v2660_v15 }
 0x16a   : > { %2547 = vmatprep.subr.bf16.mxu0 %v2662_v17 }
 0x16b   : > { %2494 = vmatpush3.bf16.msra.mxu1 %v2661_v16 }
 0x16c   : > { %2495 = vmatprep.subr.bf16.mxu1 %v2663_v18 }
 0x16d   : > { %2548 = vmatpush3.bf16.msra.mxu0 %v2662_v17 }
 0x16e   : > { %2549 = vmatprep.subr.bf16.mxu0 %v2664_v19 }
 0x16f   : > { %2496 = vmatpush3.bf16.msra.mxu1 %v2663_v18 }
 0x170   : > { %2521 = vmatprep.subr.bf16.mxu1 %v2665_v21 }
 0x171   : > { %2550 = vmatpush3.bf16.msra.mxu0 %v2664_v19 }
 0x172   : > { %2498 = vmatmul.mubr.bf16.vlgmr.msra.gmra.mrb[12].mxu1 %v2943_v0  ;;  %2551 = vmatprep.subr.bf16.mxu0 %v2668_v24 }
 0x173   : > { %2522 = vmatpush3.bf16.msra.mxu1 %v2665_v21  ;;  %2537 = vmatprep.mubr.bf16.mxu1 %v1607_v27 }
 0x174   : > { %2523 = vmatprep.subr.bf16.mxu1 %v2669_v26 }
 0x175   : > { %2552 = vmatpush3.bf16.msra.mxu0 %v2668_v24 }
 0x176   : > { %2553 = vmatprep.subr.bf16.mxu0 %v2670_v28 }
 0x177   : > { %2524 = vmatpush3.bf16.msra.mxu1 %v2669_v26 }
 0x178   : > { %2525 = vmatprep.subr.bf16.mxu1 %v2671_v29 }
 0x179   : > { %2554 = vmatpush3.bf16.msra.mxu0 %v2670_v28 }
 0x17a   : > { %2555 = vmatprep.subr.bf16.mxu0 %v2672_v30 }
 0x17b   : > { %2526 = vmatpush3.bf16.msra.mxu1 %v2671_v29 }
 0x17c   : > { %2527 = vmatprep.subr.bf16.mxu1 %v2673_v31 }
 0x17d   : > { %2556 = vmatpush3.bf16.msra.mxu0 %v2672_v30 }
 0x17f   : > { %2528 = vmatpush3.bf16.msra.mxu1 %v2673_v31 }
 0x180   : > { %2558 = vmatmul.mubr.bf16.vlgmr.msra.gmra.mrb[40].mxu0 %v1747_v9  ;;  %2529 = vmatprep.subr.bf16.mxu1 %v2674_v32 }
 0x183   : > { %2530 = vmatpush3.bf16.msra.mxu1 %v2674_v32 }
 0x184   : > { %2531 = vmatprep.subr.bf16.mxu1 %v2675_v35 }
 0x187   : > { %2532 = vmatpush3.bf16.msra.mxu1 %v2675_v35 }
 0x188   : > { %2533 = vmatprep.subr.bf16.mxu1 %v2676_v36 }
 0x18b   : > { %2534 = vmatpush3.bf16.msra.mxu1 %v2676_v36 }
 0x18c   : > { %2535 = vmatprep.subr.bf16.mxu1 %v2677_v37 }
 0x18f   : > { %2536 = vmatpush3.bf16.msra.mxu1 %v2677_v37 }
 0x192   : > { %2538 = vmatmul.mubr.bf16.vlgmr.msra.gmra.mrb[16].mxu1 %v1606_v23 }
 0x1e5   : > { %v2399_v38 = vpop.f32.mrb[0].mxu1 }
 0x1e6   : > { %v634_v33 = vpop.f32.mrb[1].mxu1 }
 0x1e7   : > { %v2400_v39 = vpop.f32.mrb[2].mxu1 }
 0x1e8   : > { %v637_v40 = vpop.f32.mrb[3].mxu1 }
 0x1ec   : > { %v2439_v41 = vpop.f32.mrb[28].mxu0 }
 0x1ed   : > { %v941_v42 = vpop.f32.mrb[29].mxu0 }
 0x1ee   : > { %v2440_v43 = vpop.f32.mrb[30].mxu0 }
 0x1ef   : > { %v944_v44 = vpop.f32.mrb[31].mxu0 }
 0x205   : > { %v2419_v45 = vpop.f32.mrb[4].mxu1 }
 0x206   : > { %v804_v46 = vadd.f32 %v2419_v45, %v2399_v38  ;;  %v788_v47 = vpop.f32.mrb[5].mxu1 }
 0x207   : > { %v802_v48 = vadd.f32 %v788_v47, %v634_v33  ;;  %v2420_v49 = vpop.f32.mrb[6].mxu1 }
 0x208   : > { %v791_v50 = vpop.f32.mrb[7].mxu1  ;;  %v957_v51 = vadd.f32 %v2439_v41, %v804_v46 }
 0x209   : > { %v803_v52 = vadd.f32 %v791_v50, %v637_v40  ;;  %v955_v53 = vadd.f32 %v941_v42, %v802_v48 }
 0x20b   : > { %v956_v54 = vadd.f32 %v944_v44, %v803_v52 }
 0x213   : > { %v2479_v55 = vpop.f32.mrb[32].mxu0 }
 0x214   : > { %v1239_v56 = vpop.f32.mrb[33].mxu0 }
 0x215   : > { %v2480_v57 = vpop.f32.mrb[34].mxu0 }
 0x216   : > { %v1242_v58 = vpop.f32.mrb[35].mxu0 }
 0x225   : > { %v2459_v59 = vpop.f32.mrb[8].mxu1 }
 0x226   : > { %v1099_v60 = vadd.f32 %v2459_v59, %v957_v51  ;;  %v1083_v61 = vpop.f32.mrb[9].mxu1 }
 0x227   : > { %v1097_v63 = vadd.f32 %v1083_v61, %v955_v53  ;;  %v2460_v0 = vpop.f32.mrb[10].mxu1 }
 0x228   : > { %v1086_v1 = vpop.f32.mrb[11].mxu1  ;;  %v1255_v2 = vadd.f32 %v2479_v55, %v1099_v60 }
 0x229   : > { %v1098_v3 = vadd.f32 %v1086_v1, %v956_v54  ;;  %v1253_v4 = vadd.f32 %v1239_v56, %v1097_v63 }
 0x22b   : > { %v1254_v5 = vadd.f32 %v1242_v58, %v1098_v3 }
 0x233   : > { %v2519_v62 = vpop.f32.mrb[36].mxu0 }
 0x234   : > { %v1550_v34 = vpop.f32.mrb[37].mxu0 }
 0x235   : > { %v2520_v6 = vpop.f32.mrb[38].mxu0 }
 0x236   : > { %v1553_v7 = vpop.f32.mrb[39].mxu0 }
 0x245   : > { %v2499_v8 = vpop.f32.mrb[12].mxu1 }
 0x246   : > { %v1410_v9 = vadd.f32 %v2499_v8, %v1255_v2  ;;  %v1394_v10 = vpop.f32.mrb[13].mxu1 }
 0x247   : > { %v1408_v11 = vadd.f32 %v1394_v10, %v1253_v4  ;;  %v2500_v12 = vpop.f32.mrb[14].mxu1 }
 0x248   : > { %v1397_v13 = vpop.f32.mrb[15].mxu1  ;;  %v1566_v14 = vadd.f32 %v2519_v62, %v1410_v9 }
 0x249   : > { %v1409_v15 = vadd.f32 %v1397_v13, %v1254_v5  ;;  %v1564_v16 = vadd.f32 %v1550_v34, %v1408_v11 }
 0x24b   : > { %v1565_v17 = vadd.f32 %v1553_v7, %v1409_v15 }
 0x253   : > { %v2559_v18 = vpop.f32.mrb[40].mxu0 }
 0x254   : > { %v1833_v19 = vpop.f32.mrb[41].mxu0 }
 0x255   : > { %v2560_v20 = vpop.f32.mrb[42].mxu0 }
 0x256   : > { %v1836_v21 = vpop.f32.mrb[43].mxu0 }
 0x265   : > { %v2539_v22 = vpop.f32.mrb[16].mxu1 }
 0x266   : > { %v1708_v23 = vadd.f32 %v2539_v22, %v1566_v14  ;;  %v1692_v24 = vpop.f32.mrb[17].mxu1 }
 0x267   : > { %v1706_v26 = vadd.f32 %v1692_v24, %v1564_v16  ;;  %v2540_v27 = vpop.f32.mrb[18].mxu1 }
 0x268   : > { %v1849_v28 = vadd.f32 %v2559_v18, %v1708_v23  ;;  %v1695_v29 = vpop.f32.mrb[19].mxu1 }
 0x269   : > { %v1847_v30 = vadd.f32 %v1833_v19, %v1706_v26  ;;  %v1707_v31 = vadd.f32 %v1695_v29, %v1565_v17 }
 0x26a   : > { %v1865_v32 = vadd.f32 %v2181_v25, %v1849_v28 }
 0x26b   : > { %v1863_v35 = vadd.f32 %v2181_v25, %v1847_v30  ;;  %v1848_v36 = vadd.f32 %v1836_v21, %v1707_v31 }
 0x26c   : > { %v1868_v37 = vmax.f32 %v1865_v32, 0.0 }
 0x26d   : > { %v1866_v38 = vmax.f32 %v1863_v35, 0.0  ;;  %v1864_v33 = vadd.f32 %v2181_v25, %v1848_v36 }
 0x26e   : > { %1871 = vst [vmem:[%s224_s30 + $0x10] sm:$0xff] %v1868_v37 }
 0x26f   : > { %1869 = vst [vmem:[%s224_s30] sm:$0xff] %v1866_v38  ;;  %v1867_v39 = vmax.f32 %v1864_v33, 0.0 }
 0x271   : > { %1870 = vst [vmem:[%s224_s30 + $0x8] sm:$0xff] %v1867_v39 }
 0x272 PF: > { %s15_s18 = sadd.s32 1, %s2684_s18  }
 0x273   : > { %p12_p4 = scmp.ge.s32.totalorder %s15_s18, 4  }
 0x275   :  { %14 = sbr.rel (!%p12_p4) target bundleno = 1 (0x1), region = 78 }

</bundles_post_ra>
